<compile_context>
chip_gen: v6e
topology: v6e:2x2x1
jax: 0.10.0
libtpu: 0.0.40
codegen_flags: <defaults>
</compile_context>

<pallas_src>
import jax
import jax.numpy as jnp
from jax.experimental import pallas as pl
from jax.experimental.pallas import tpu as pltpu


_BN_EPS = 1e-5
_BN_SCALE = (1.0 + _BN_EPS) ** -0.5   # fresh running stats: y = x / sqrt(1+eps)


# ---------------------------------------------------------------------------
# Fused kernel: whole MATCH forward (no scratch, activations stay in vregs)
# ---------------------------------------------------------------------------
def _match_fused_kernel(
        x_ref, mask_ref, base_ref,
        item_w_ref,
        s1w_ref, s1b_ref,
        s2w_ref, s2b_ref,
        s3w_ref, s3b_ref,
        s4w_ref, s4b_ref,
        w1a_ref, w1b_ref, b1_ref,
        w2_ref, b2_ref,
        w3_ref, b3_ref,
        o_ref):
    f32 = jnp.float32
    B = x_ref.shape[0]

    def bmm(w, x):
        """w: (Cout, Cred) bf16 weight; x: (B, Cred, L) f32 -> (B, Cout, L) f32.

        One batched MXU matmul (bf16 operands, f32 accumulation); the weight is
        broadcast once along the leading (untiled) batch dim.
        """
        w_b = jnp.broadcast_to(w[None], (B,) + w.shape)
        return jnp.einsum('bok,bkl->bol', w_b, x.astype(jnp.bfloat16),
                          preferred_element_type=f32)

    def conv_stage(a, w_ref_, b_ref_, K, pad):
        """Fused (long||mask) conv stage: pad -> im2col -> ONE dot -> bias -> ReLU.

        a: (B, Cin, Lin) f32.  Weight is the im2col/merged (Cout, K*Cin) bf16
        matrix; bias is (1, Cout, 1) f32.
        """
        Bv, Cin, _ = a.shape
        if pad:
            z = jnp.zeros((Bv, Cin, pad), f32)
            a = jnp.concatenate([z, a, z], axis=2)
        Lout = a.shape[2] - K + 1
        # im2col: K shifted views stacked along channels -> (B, K*Cin, Lout)
        cols = jnp.concatenate([a[:, :, k:k + Lout] for k in range(K)], axis=1)
        y = bmm(w_ref_[...], cols) + b_ref_[...]
        return jnp.maximum(y, 0.0)

    # --- item: grouped 1x1 conv (bias=False) as dense block-diag matmul + ReLU
    xi = jnp.maximum(bmm(item_w_ref[...], x_ref[...]), 0.0)        # (B, n_items, L)

    # --- stage-1 input = cat(item(x), mask); every later torch.cat is folded
    #     into the block-diagonal merged stage weights.
    a = jnp.concatenate([xi, mask_ref[...]], axis=1)               # (B, 2*n_items, L)
    a = conv_stage(a, s1w_ref, s1b_ref, K=5, pad=3)                # (B, 24, L+2)
    a = conv_stage(a, s2w_ref, s2b_ref, K=5, pad=3)                # (B, 24, L+4)
    a = conv_stage(a, s3w_ref, s3b_ref, K=5, pad=3)                # (B, 24, L+6)
    a = conv_stage(a, s4w_ref, s4b_ref, K=3, pad=0)                # (B, 16, L+4)

    # --- survival head: adaptive_avg_pool1d(.,1) + cat(base) + 3-layer MLP
    #     (eval mode: Dropout identity; BatchNorm1d with fresh running stats)
    pooled = jnp.mean(a, axis=2)                                   # (B, 16)
    h = (jnp.dot(pooled, w1a_ref[...], preferred_element_type=f32)
         + jnp.dot(base_ref[...], w1b_ref[...], preferred_element_type=f32)
         + b1_ref[...])
    h = jnp.maximum(h, 0.0) * _BN_SCALE
    h = jnp.dot(h, w2_ref[...], preferred_element_type=f32) + b2_ref[...]
    h = jnp.maximum(h, 0.0) * _BN_SCALE
    o_ref[...] = jnp.dot(h, w3_ref[...], preferred_element_type=f32) + b3_ref[...]


# ---------------------------------------------------------------------------
# Wrapper: one gridless, all-VMEM pallas_call for the full forward
# ---------------------------------------------------------------------------
@jax.jit
def match_forward(p, long, base, mask):
    B, n_items, n_cat, L = long.shape
    x = long.reshape(B, n_items * n_cat, L)            # only wrapper-side op
    out_len = p["lin3_b"].shape[1]

    args = (x, mask, base,
            p["item_w"],
            p["s1_w"], p["s1_b"],
            p["s2_w"], p["s2_b"],
            p["s3_w"], p["s3_b"],
            p["s4_w"], p["s4_b"],
            p["lin1_wa_t"], p["lin1_wb_t"], p["lin1_b"],
            p["lin2_w_t"], p["lin2_b"],
            p["lin3_w_t"], p["lin3_b"])

    vmem_specs = [pl.BlockSpec(memory_space=pltpu.MemorySpace.VMEM) for _ in args]
    # Note: for production batch sizes (B >> 8) add a grid over batch with
    # constant index_maps for the weights and
    # compiler_params=pltpu.CompilerParams(dimension_semantics=("parallel",)).
    return pl.pallas_call(
        _match_fused_kernel,
        out_shape=jax.ShapeDtypeStruct((B, out_len), jnp.float32),
        in_specs=vmem_specs,
        out_specs=pl.BlockSpec(memory_space=pltpu.MemorySpace.VMEM),
    )(*args)


# ---------------------------------------------------------------------------
# Deterministic parameter construction (all layout prep done here, once)
# ---------------------------------------------------------------------------
def make_params(key, n_items, n_cat, n_base, out_len):
    keys = jax.random.split(key, 32)
    ki = iter(keys)

    def rn(shape, scale=0.1):
        return scale * jax.random.normal(next(ki), shape, jnp.float32)

    def to_im2col(w):
        """(Cout, Cin, K) PyTorch conv weight -> (Cout, K*Cin) im2col matrix
        matching cols index = k*Cin + cin."""
        co, ci, k = w.shape
        return jnp.transpose(w, (0, 2, 1)).reshape(co, k * ci)

    p = {}

    # item: grouped 1x1 conv weight (n_items, n_cat, 1) -> dense block-diagonal
    # (n_items, n_items*n_cat); bias=False.
    w_item_g = rn((n_items, n_cat))
    w_dense = jnp.zeros((n_items, n_items * n_cat), jnp.float32)
    for i in range(n_items):
        w_dense = w_dense.at[i, i * n_cat:(i + 1) * n_cat].set(w_item_g[i])
    p["item_w"] = w_dense.astype(jnp.bfloat16)

    # per-layer PyTorch-style conv weights
    long1_w, long1_b = rn((16, n_items, 5)), rn((16,))
    mask1_w, mask1_b = rn((8, n_items, 5)), rn((8,))
    long2_w, long2_b = rn((16, 24, 5)), rn((16,))
    mask2_w, mask2_b = rn((8, 8, 5)), rn((8,))
    long3_w, long3_b = rn((16, 24, 5)), rn((16,))
    mask3_w, mask3_b = rn((8, 8, 5)), rn((8,))
    long4_w, long4_b = rn((16, 24, 3)), rn((16,))

    # stage 1: block-diagonal over cat(item_out[n_items], mask[n_items])
    w1 = jnp.zeros((24, 2 * n_items, 5), jnp.float32)
    w1 = w1.at[0:16, 0:n_items, :].set(long1_w)
    w1 = w1.at[16:24, n_items:2 * n_items, :].set(mask1_w)
    p["s1_w"] = to_im2col(w1).astype(jnp.bfloat16)
    p["s1_b"] = jnp.concatenate([long1_b, mask1_b]).reshape(1, 24, 1)

    # stages 2/3: longN reads all 24 channels, maskN reads channels 16:24
    def merge_stage(lw, lb, mw, mb):
        w = jnp.zeros((24, 24, 5), jnp.float32)
        w = w.at[0:16, :, :].set(lw)
        w = w.at[16:24, 16:24, :].set(mw)
        b = jnp.concatenate([lb, mb]).reshape(1, 24, 1)
        return to_im2col(w).astype(jnp.bfloat16), b

    p["s2_w"], p["s2_b"] = merge_stage(long2_w, long2_b, mask2_w, mask2_b)
    p["s3_w"], p["s3_b"] = merge_stage(long3_w, long3_b, mask3_w, mask3_b)

    # stage 4: long4 alone (k=3, padding=0)
    p["s4_w"] = to_im2col(long4_w).astype(jnp.bfloat16)
    p["s4_b"] = long4_b.reshape(1, 16, 1)

    # survival head: split + pre-transpose Linear weights once (f32 is fine here)
    w1l = rn((16, 16 + n_base))                           # PyTorch (out, in)
    p["lin1_wa_t"] = jnp.transpose(w1l[:, :16])           # (16, 16)   pooled part
    p["lin1_wb_t"] = jnp.transpose(w1l[:, 16:])           # (n_base, 16) base part
    p["lin1_b"] = rn((16,)).reshape(1, 16)
    p["lin2_w_t"] = jnp.transpose(rn((16, 16)))           # (16, 16)
    p["lin2_b"] = rn((16,)).reshape(1, 16)
    p["lin3_w_t"] = jnp.transpose(rn((out_len, 16)))      # (16, out_len)
    p["lin3_b"] = rn((out_len,)).reshape(1, out_len)
    return p


# ---------------------------------------------------------------------------
if __name__ == "__main__":
    B, n_items, n_cat, L = 2, 4, 3, 16
    n_base, out_len = 5, 6

    root = jax.random.PRNGKey(0)
    k_par, k_long, k_base, k_mask = jax.random.split(root, 4)

    params = make_params(k_par, n_items, n_cat, n_base, out_len)
    long_in = jax.random.normal(k_long, (B, n_items, n_cat, L), jnp.float32)
    base_in = jax.random.normal(k_base, (B, n_base), jnp.float32)
    mask_in = jax.random.normal(k_mask, (B, n_items, L), jnp.float32)

    out = match_forward(params, long_in, base_in, mask_in)
    out = jax.block_until_ready(out)
    assert out.shape == (B, out_len), out.shape
    assert bool(jnp.all(jnp.isfinite(out)))
    print("KERNEL_OK")
</pallas_src>

<mosaic_0001>
module attributes {stable_mosaic.version = 11 : i64} {
  func.func @_match_fused_kernel(%arg0: memref<2x12x16xf32, #tpu.memory_space<vmem>>, %arg1: memref<2x4x16xf32, #tpu.memory_space<vmem>>, %arg2: memref<2x5xf32, #tpu.memory_space<vmem>>, %arg3: memref<4x12xbf16, #tpu.memory_space<vmem>>, %arg4: memref<24x40xbf16, #tpu.memory_space<vmem>>, %arg5: memref<1x24x1xf32, #tpu.memory_space<vmem>>, %arg6: memref<24x120xbf16, #tpu.memory_space<vmem>>, %arg7: memref<1x24x1xf32, #tpu.memory_space<vmem>>, %arg8: memref<24x120xbf16, #tpu.memory_space<vmem>>, %arg9: memref<1x24x1xf32, #tpu.memory_space<vmem>>, %arg10: memref<16x72xbf16, #tpu.memory_space<vmem>>, %arg11: memref<1x16x1xf32, #tpu.memory_space<vmem>>, %arg12: memref<16x16xf32, #tpu.memory_space<vmem>>, %arg13: memref<5x16xf32, #tpu.memory_space<vmem>>, %arg14: memref<1x16xf32, #tpu.memory_space<vmem>>, %arg15: memref<16x16xf32, #tpu.memory_space<vmem>>, %arg16: memref<1x16xf32, #tpu.memory_space<vmem>>, %arg17: memref<16x6xf32, #tpu.memory_space<vmem>>, %arg18: memref<1x6xf32, #tpu.memory_space<vmem>>, %arg19: memref<2x6xf32, #tpu.memory_space<vmem>>) attributes {dimension_semantics = [], scalar_prefetch = 0 : i64, scratch_operands = 0 : i64, tpu.core_type = #tpu.core_type<tc>} {
    %c0 = arith.constant 0 : index
    %c0_0 = arith.constant 0 : index
    %0 = vector.load %arg3[%c0, %c0_0] : memref<4x12xbf16, #tpu.memory_space<vmem>>, vector<4x12xbf16>
    %c0_1 = arith.constant 0 : index
    %c0_2 = arith.constant 0 : index
    %c0_3 = arith.constant 0 : index
    %1 = vector.load %arg0[%c0_1, %c0_2, %c0_3] : memref<2x12x16xf32, #tpu.memory_space<vmem>>, vector<2x12x16xf32>
    %2 = vector.shape_cast %0 : vector<4x12xbf16> to vector<1x4x12xbf16>
    %3 = vector.shape_cast %2 : vector<1x4x12xbf16> to vector<1x4x12xbf16>
    %4 = vector.broadcast %3 : vector<1x4x12xbf16> to vector<2x4x12xbf16>
    %5 = arith.truncf %1 : vector<2x12x16xf32> to vector<2x12x16xbf16>
    "tpu.trace_start"() <{level = 10 : i32, message = "bok,bkl->bol"}> : () -> ()
    %cst = arith.constant dense<0.000000e+00> : vector<2x4x16xf32>
    %6 = tpu.matmul %4, %5, %cst {dimension_numbers = #tpu.dot_dimension_numbers<[2], [1], [1], [2], [0, 0, 0, 1, 1, 2], [0], [0]>} : vector<2x4x12xbf16>, vector<2x12x16xbf16>, vector<2x4x16xf32> -> vector<2x4x16xf32>
    "tpu.trace_stop"() : () -> ()
    %cst_4 = arith.constant 0.000000e+00 : f32
    %7 = vector.broadcast %cst_4 : f32 to vector<2x4x16xf32>
    %8 = arith.maximumf %6, %7 : vector<2x4x16xf32>
    %c0_5 = arith.constant 0 : index
    %c0_6 = arith.constant 0 : index
    %c0_7 = arith.constant 0 : index
    %9 = vector.load %arg1[%c0_5, %c0_6, %c0_7] : memref<2x4x16xf32, #tpu.memory_space<vmem>>, vector<2x4x16xf32>
    %10 = tpu.concatenate %8, %9 in 1 : vector<2x4x16xf32>, vector<2x4x16xf32> -> vector<2x8x16xf32>
    %cst_8 = arith.constant 0.000000e+00 : f32
    %11 = vector.broadcast %cst_8 : f32 to vector<2x8x3xf32>
    %12 = tpu.concatenate %11, %10, %11 in 2 : vector<2x8x3xf32>, vector<2x8x16xf32>, vector<2x8x3xf32> -> vector<2x8x22xf32>
    %13 = vector.extract_strided_slice %12 {offsets = [0, 0, 0], sizes = [2, 8, 18], strides = [1, 1, 1]} : vector<2x8x22xf32> to vector<2x8x18xf32>
    %14 = vector.extract_strided_slice %12 {offsets = [0, 0, 1], sizes = [2, 8, 18], strides = [1, 1, 1]} : vector<2x8x22xf32> to vector<2x8x18xf32>
    %15 = vector.extract_strided_slice %12 {offsets = [0, 0, 2], sizes = [2, 8, 18], strides = [1, 1, 1]} : vector<2x8x22xf32> to vector<2x8x18xf32>
    %16 = vector.extract_strided_slice %12 {offsets = [0, 0, 3], sizes = [2, 8, 18], strides = [1, 1, 1]} : vector<2x8x22xf32> to vector<2x8x18xf32>
    %17 = vector.extract_strided_slice %12 {offsets = [0, 0, 4], sizes = [2, 8, 18], strides = [1, 1, 1]} : vector<2x8x22xf32> to vector<2x8x18xf32>
    %18 = tpu.concatenate %13, %14, %15, %16, %17 in 1 : vector<2x8x18xf32>, vector<2x8x18xf32>, vector<2x8x18xf32>, vector<2x8x18xf32>, vector<2x8x18xf32> -> vector<2x40x18xf32>
    %c0_9 = arith.constant 0 : index
    %c0_10 = arith.constant 0 : index
    %19 = vector.load %arg4[%c0_9, %c0_10] : memref<24x40xbf16, #tpu.memory_space<vmem>>, vector<24x40xbf16>
    %20 = vector.shape_cast %19 : vector<24x40xbf16> to vector<1x24x40xbf16>
    %21 = vector.shape_cast %20 : vector<1x24x40xbf16> to vector<1x24x40xbf16>
    %22 = vector.broadcast %21 : vector<1x24x40xbf16> to vector<2x24x40xbf16>
    %23 = arith.truncf %18 : vector<2x40x18xf32> to vector<2x40x18xbf16>
    "tpu.trace_start"() <{level = 10 : i32, message = "bok,bkl->bol"}> : () -> ()
    %cst_11 = arith.constant dense<0.000000e+00> : vector<2x24x18xf32>
    %24 = tpu.matmul %22, %23, %cst_11 {dimension_numbers = #tpu.dot_dimension_numbers<[2], [1], [1], [2], [0, 0, 0, 1, 1, 2], [0], [0]>} : vector<2x24x40xbf16>, vector<2x40x18xbf16>, vector<2x24x18xf32> -> vector<2x24x18xf32>
    "tpu.trace_stop"() : () -> ()
    %c0_12 = arith.constant 0 : index
    %c0_13 = arith.constant 0 : index
    %c0_14 = arith.constant 0 : index
    %25 = vector.load %arg5[%c0_12, %c0_13, %c0_14] : memref<1x24x1xf32, #tpu.memory_space<vmem>>, vector<1x24x1xf32>
    %26 = vector.broadcast %25 : vector<1x24x1xf32> to vector<2x24x18xf32>
    %27 = arith.addf %24, %26 : vector<2x24x18xf32>
    %cst_15 = arith.constant 0.000000e+00 : f32
    %28 = vector.broadcast %cst_15 : f32 to vector<2x24x18xf32>
    %29 = arith.maximumf %27, %28 : vector<2x24x18xf32>
    %cst_16 = arith.constant 0.000000e+00 : f32
    %30 = vector.broadcast %cst_16 : f32 to vector<2x24x3xf32>
    %31 = tpu.concatenate %30, %29, %30 in 2 : vector<2x24x3xf32>, vector<2x24x18xf32>, vector<2x24x3xf32> -> vector<2x24x24xf32>
    %32 = vector.extract_strided_slice %31 {offsets = [0, 0, 0], sizes = [2, 24, 20], strides = [1, 1, 1]} : vector<2x24x24xf32> to vector<2x24x20xf32>
    %33 = vector.extract_strided_slice %31 {offsets = [0, 0, 1], sizes = [2, 24, 20], strides = [1, 1, 1]} : vector<2x24x24xf32> to vector<2x24x20xf32>
    %34 = vector.extract_strided_slice %31 {offsets = [0, 0, 2], sizes = [2, 24, 20], strides = [1, 1, 1]} : vector<2x24x24xf32> to vector<2x24x20xf32>
    %35 = vector.extract_strided_slice %31 {offsets = [0, 0, 3], sizes = [2, 24, 20], strides = [1, 1, 1]} : vector<2x24x24xf32> to vector<2x24x20xf32>
    %36 = vector.extract_strided_slice %31 {offsets = [0, 0, 4], sizes = [2, 24, 20], strides = [1, 1, 1]} : vector<2x24x24xf32> to vector<2x24x20xf32>
    %37 = tpu.concatenate %32, %33, %34, %35, %36 in 1 : vector<2x24x20xf32>, vector<2x24x20xf32>, vector<2x24x20xf32>, vector<2x24x20xf32>, vector<2x24x20xf32> -> vector<2x120x20xf32>
    %c0_17 = arith.constant 0 : index
    %c0_18 = arith.constant 0 : index
    %38 = vector.load %arg6[%c0_17, %c0_18] : memref<24x120xbf16, #tpu.memory_space<vmem>>, vector<24x120xbf16>
    %39 = vector.shape_cast %38 : vector<24x120xbf16> to vector<1x24x120xbf16>
    %40 = vector.shape_cast %39 : vector<1x24x120xbf16> to vector<1x24x120xbf16>
    %41 = vector.broadcast %40 : vector<1x24x120xbf16> to vector<2x24x120xbf16>
    %42 = arith.truncf %37 : vector<2x120x20xf32> to vector<2x120x20xbf16>
    "tpu.trace_start"() <{level = 10 : i32, message = "bok,bkl->bol"}> : () -> ()
    %cst_19 = arith.constant dense<0.000000e+00> : vector<2x24x20xf32>
    %43 = tpu.matmul %41, %42, %cst_19 {dimension_numbers = #tpu.dot_dimension_numbers<[2], [1], [1], [2], [0, 0, 0, 1, 1, 2], [0], [0]>} : vector<2x24x120xbf16>, vector<2x120x20xbf16>, vector<2x24x20xf32> -> vector<2x24x20xf32>
    "tpu.trace_stop"() : () -> ()
    %c0_20 = arith.constant 0 : index
    %c0_21 = arith.constant 0 : index
    %c0_22 = arith.constant 0 : index
    %44 = vector.load %arg7[%c0_20, %c0_21, %c0_22] : memref<1x24x1xf32, #tpu.memory_space<vmem>>, vector<1x24x1xf32>
    %45 = vector.broadcast %44 : vector<1x24x1xf32> to vector<2x24x20xf32>
    %46 = arith.addf %43, %45 : vector<2x24x20xf32>
    %cst_23 = arith.constant 0.000000e+00 : f32
    %47 = vector.broadcast %cst_23 : f32 to vector<2x24x20xf32>
    %48 = arith.maximumf %46, %47 : vector<2x24x20xf32>
    %cst_24 = arith.constant 0.000000e+00 : f32
    %49 = vector.broadcast %cst_24 : f32 to vector<2x24x3xf32>
    %50 = tpu.concatenate %49, %48, %49 in 2 : vector<2x24x3xf32>, vector<2x24x20xf32>, vector<2x24x3xf32> -> vector<2x24x26xf32>
    %51 = vector.extract_strided_slice %50 {offsets = [0, 0, 0], sizes = [2, 24, 22], strides = [1, 1, 1]} : vector<2x24x26xf32> to vector<2x24x22xf32>
    %52 = vector.extract_strided_slice %50 {offsets = [0, 0, 1], sizes = [2, 24, 22], strides = [1, 1, 1]} : vector<2x24x26xf32> to vector<2x24x22xf32>
    %53 = vector.extract_strided_slice %50 {offsets = [0, 0, 2], sizes = [2, 24, 22], strides = [1, 1, 1]} : vector<2x24x26xf32> to vector<2x24x22xf32>
    %54 = vector.extract_strided_slice %50 {offsets = [0, 0, 3], sizes = [2, 24, 22], strides = [1, 1, 1]} : vector<2x24x26xf32> to vector<2x24x22xf32>
    %55 = vector.extract_strided_slice %50 {offsets = [0, 0, 4], sizes = [2, 24, 22], strides = [1, 1, 1]} : vector<2x24x26xf32> to vector<2x24x22xf32>
    %56 = tpu.concatenate %51, %52, %53, %54, %55 in 1 : vector<2x24x22xf32>, vector<2x24x22xf32>, vector<2x24x22xf32>, vector<2x24x22xf32>, vector<2x24x22xf32> -> vector<2x120x22xf32>
    %c0_25 = arith.constant 0 : index
    %c0_26 = arith.constant 0 : index
    %57 = vector.load %arg8[%c0_25, %c0_26] : memref<24x120xbf16, #tpu.memory_space<vmem>>, vector<24x120xbf16>
    %58 = vector.shape_cast %57 : vector<24x120xbf16> to vector<1x24x120xbf16>
    %59 = vector.shape_cast %58 : vector<1x24x120xbf16> to vector<1x24x120xbf16>
    %60 = vector.broadcast %59 : vector<1x24x120xbf16> to vector<2x24x120xbf16>
    %61 = arith.truncf %56 : vector<2x120x22xf32> to vector<2x120x22xbf16>
    "tpu.trace_start"() <{level = 10 : i32, message = "bok,bkl->bol"}> : () -> ()
    %cst_27 = arith.constant dense<0.000000e+00> : vector<2x24x22xf32>
    %62 = tpu.matmul %60, %61, %cst_27 {dimension_numbers = #tpu.dot_dimension_numbers<[2], [1], [1], [2], [0, 0, 0, 1, 1, 2], [0], [0]>} : vector<2x24x120xbf16>, vector<2x120x22xbf16>, vector<2x24x22xf32> -> vector<2x24x22xf32>
    "tpu.trace_stop"() : () -> ()
    %c0_28 = arith.constant 0 : index
    %c0_29 = arith.constant 0 : index
    %c0_30 = arith.constant 0 : index
    %63 = vector.load %arg9[%c0_28, %c0_29, %c0_30] : memref<1x24x1xf32, #tpu.memory_space<vmem>>, vector<1x24x1xf32>
    %64 = vector.broadcast %63 : vector<1x24x1xf32> to vector<2x24x22xf32>
    %65 = arith.addf %62, %64 : vector<2x24x22xf32>
    %cst_31 = arith.constant 0.000000e+00 : f32
    %66 = vector.broadcast %cst_31 : f32 to vector<2x24x22xf32>
    %67 = arith.maximumf %65, %66 : vector<2x24x22xf32>
    %68 = vector.extract_strided_slice %67 {offsets = [0, 0, 0], sizes = [2, 24, 20], strides = [1, 1, 1]} : vector<2x24x22xf32> to vector<2x24x20xf32>
    %69 = vector.extract_strided_slice %67 {offsets = [0, 0, 1], sizes = [2, 24, 20], strides = [1, 1, 1]} : vector<2x24x22xf32> to vector<2x24x20xf32>
    %70 = vector.extract_strided_slice %67 {offsets = [0, 0, 2], sizes = [2, 24, 20], strides = [1, 1, 1]} : vector<2x24x22xf32> to vector<2x24x20xf32>
    %71 = tpu.concatenate %68, %69, %70 in 1 : vector<2x24x20xf32>, vector<2x24x20xf32>, vector<2x24x20xf32> -> vector<2x72x20xf32>
    %c0_32 = arith.constant 0 : index
    %c0_33 = arith.constant 0 : index
    %72 = vector.load %arg10[%c0_32, %c0_33] : memref<16x72xbf16, #tpu.memory_space<vmem>>, vector<16x72xbf16>
    %73 = vector.shape_cast %72 : vector<16x72xbf16> to vector<1x16x72xbf16>
    %74 = vector.shape_cast %73 : vector<1x16x72xbf16> to vector<1x16x72xbf16>
    %75 = vector.broadcast %74 : vector<1x16x72xbf16> to vector<2x16x72xbf16>
    %76 = arith.truncf %71 : vector<2x72x20xf32> to vector<2x72x20xbf16>
    "tpu.trace_start"() <{level = 10 : i32, message = "bok,bkl->bol"}> : () -> ()
    %cst_34 = arith.constant dense<0.000000e+00> : vector<2x16x20xf32>
    %77 = tpu.matmul %75, %76, %cst_34 {dimension_numbers = #tpu.dot_dimension_numbers<[2], [1], [1], [2], [0, 0, 0, 1, 1, 2], [0], [0]>} : vector<2x16x72xbf16>, vector<2x72x20xbf16>, vector<2x16x20xf32> -> vector<2x16x20xf32>
    "tpu.trace_stop"() : () -> ()
    %c0_35 = arith.constant 0 : index
    %c0_36 = arith.constant 0 : index
    %c0_37 = arith.constant 0 : index
    %78 = vector.load %arg11[%c0_35, %c0_36, %c0_37] : memref<1x16x1xf32, #tpu.memory_space<vmem>>, vector<1x16x1xf32>
    %79 = vector.broadcast %78 : vector<1x16x1xf32> to vector<2x16x20xf32>
    %80 = arith.addf %77, %79 : vector<2x16x20xf32>
    %cst_38 = arith.constant 0.000000e+00 : f32
    %81 = vector.broadcast %cst_38 : f32 to vector<2x16x20xf32>
    %82 = arith.maximumf %80, %81 : vector<2x16x20xf32>
    %cst_39 = arith.constant dense<0.000000e+00> : vector<2x16xf32>
    %83 = vector.multi_reduction <add>, %82, %cst_39 [2] : vector<2x16x20xf32> to vector<2x16xf32>
    %cst_40 = arith.constant 2.000000e+01 : f32
    %84 = vector.broadcast %cst_40 : f32 to vector<2x16xf32>
    %85 = arith.divf %83, %84 : vector<2x16xf32>
    %c0_41 = arith.constant 0 : index
    %c0_42 = arith.constant 0 : index
    %86 = vector.load %arg12[%c0_41, %c0_42] : memref<16x16xf32, #tpu.memory_space<vmem>>, vector<16x16xf32>
    %cst_43 = arith.constant dense<0.000000e+00> : vector<2x16xf32>
    %87 = tpu.matmul %85, %86, %cst_43 {dimension_numbers = #tpu.dot_dimension_numbers<[1], [0], [0], [1], [0, 0, 1, 1], [], []>} : vector<2x16xf32>, vector<16x16xf32>, vector<2x16xf32> -> vector<2x16xf32>
    %c0_44 = arith.constant 0 : index
    %c0_45 = arith.constant 0 : index
    %88 = vector.load %arg2[%c0_44, %c0_45] : memref<2x5xf32, #tpu.memory_space<vmem>>, vector<2x5xf32>
    %c0_46 = arith.constant 0 : index
    %c0_47 = arith.constant 0 : index
    %89 = vector.load %arg13[%c0_46, %c0_47] : memref<5x16xf32, #tpu.memory_space<vmem>>, vector<5x16xf32>
    %cst_48 = arith.constant dense<0.000000e+00> : vector<2x16xf32>
    %90 = tpu.matmul %88, %89, %cst_48 {dimension_numbers = #tpu.dot_dimension_numbers<[1], [0], [0], [1], [0, 0, 1, 1], [], []>} : vector<2x5xf32>, vector<5x16xf32>, vector<2x16xf32> -> vector<2x16xf32>
    %91 = arith.addf %87, %90 : vector<2x16xf32>
    %c0_49 = arith.constant 0 : index
    %c0_50 = arith.constant 0 : index
    %92 = vector.load %arg14[%c0_49, %c0_50] : memref<1x16xf32, #tpu.memory_space<vmem>>, vector<1x16xf32>
    %93 = vector.broadcast %92 : vector<1x16xf32> to vector<2x16xf32>
    %94 = arith.addf %91, %93 : vector<2x16xf32>
    %cst_51 = arith.constant 0.000000e+00 : f32
    %95 = vector.broadcast %cst_51 : f32 to vector<2x16xf32>
    %96 = arith.maximumf %94, %95 : vector<2x16xf32>
    %cst_52 = arith.constant 0.999994993 : f32
    %97 = vector.broadcast %cst_52 : f32 to vector<2x16xf32>
    %98 = arith.mulf %96, %97 : vector<2x16xf32>
    %c0_53 = arith.constant 0 : index
    %c0_54 = arith.constant 0 : index
    %99 = vector.load %arg15[%c0_53, %c0_54] : memref<16x16xf32, #tpu.memory_space<vmem>>, vector<16x16xf32>
    %cst_55 = arith.constant dense<0.000000e+00> : vector<2x16xf32>
    %100 = tpu.matmul %98, %99, %cst_55 {dimension_numbers = #tpu.dot_dimension_numbers<[1], [0], [0], [1], [0, 0, 1, 1], [], []>} : vector<2x16xf32>, vector<16x16xf32>, vector<2x16xf32> -> vector<2x16xf32>
    %c0_56 = arith.constant 0 : index
    %c0_57 = arith.constant 0 : index
    %101 = vector.load %arg16[%c0_56, %c0_57] : memref<1x16xf32, #tpu.memory_space<vmem>>, vector<1x16xf32>
    %102 = vector.broadcast %101 : vector<1x16xf32> to vector<2x16xf32>
    %103 = arith.addf %100, %102 : vector<2x16xf32>
    %cst_58 = arith.constant 0.000000e+00 : f32
    %104 = vector.broadcast %cst_58 : f32 to vector<2x16xf32>
    %105 = arith.maximumf %103, %104 : vector<2x16xf32>
    %cst_59 = arith.constant 0.999994993 : f32
    %106 = vector.broadcast %cst_59 : f32 to vector<2x16xf32>
    %107 = arith.mulf %105, %106 : vector<2x16xf32>
    %c0_60 = arith.constant 0 : index
    %c0_61 = arith.constant 0 : index
    %108 = vector.load %arg17[%c0_60, %c0_61] : memref<16x6xf32, #tpu.memory_space<vmem>>, vector<16x6xf32>
    %cst_62 = arith.constant dense<0.000000e+00> : vector<2x6xf32>
    %109 = tpu.matmul %107, %108, %cst_62 {dimension_numbers = #tpu.dot_dimension_numbers<[1], [0], [0], [1], [0, 0, 1, 1], [], []>} : vector<2x16xf32>, vector<16x6xf32>, vector<2x6xf32> -> vector<2x6xf32>
    %c0_63 = arith.constant 0 : index
    %c0_64 = arith.constant 0 : index
    %110 = vector.load %arg18[%c0_63, %c0_64] : memref<1x6xf32, #tpu.memory_space<vmem>>, vector<1x6xf32>
    %111 = vector.broadcast %110 : vector<1x6xf32> to vector<2x6xf32>
    %112 = arith.addf %109, %111 : vector<2x6xf32>
    %c0_65 = arith.constant 0 : index
    %c0_66 = arith.constant 0 : index
    %113 = vector.load %arg19[%c0_65, %c0_66] : memref<2x6xf32, #tpu.memory_space<vmem>>, vector<2x6xf32>
    tpu.vector_store %arg19[%c0_65, %c0_66], %112 {strides = array<i32>} : memref<2x6xf32, #tpu.memory_space<vmem>>, vector<2x6xf32>,
    return
  }
}

</mosaic_0001>

<bundles_post_ra>
// kernel: match_forward.1
= control target key start
LH: loop header
LB: loop body
LE: loop exit
PB: predicated region body
PF: predicated region fallthrough
CT: control target
= control target key end

     0   :  { %s2462_s0 = inlined_call_operand.vmem [shape: f32[2,12,16], index: 0, kind: input, shape index: {}]   ;;  %s2463_s1 = inlined_call_operand.vmem [shape: f32[2,4,16], index: 1, kind: input, shape index: {}]   ;;  %s2464_s2 = inlined_call_operand.vmem [shape: f32[2,5], index: 2, kind: input, shape index: {}]   ;;  %s2465_s3 = inlined_call_operand.vmem [shape: bf16[4,12], index: 3, kind: input, shape index: {}]   ;;  %s2466_s4 = inlined_call_operand.vmem [shape: bf16[24,40], index: 4, kind: input, shape index: {}]   ;;  %s2467_s5 = inlined_call_operand.vmem [shape: f32[1,24,1], index: 5, kind: input, shape index: {}]   ;;  %s2468_s6 = inlined_call_operand.vmem [shape: bf16[24,120], index: 6, kind: input, shape index: {}]   ;;  %s2469_s7 = inlined_call_operand.vmem [shape: f32[1,24,1], index: 7, kind: input, shape index: {}]   ;;  %s2470_s8 = inlined_call_operand.vmem [shape: bf16[24,120], index: 8, kind: input, shape index: {}]   ;;  %s2471_s9 = inlined_call_operand.vmem [shape: f32[1,24,1], index: 9, kind: input, shape index: {}]   ;;  %s2472_s10 = inlined_call_operand.vmem [shape: bf16[16,72], index: 10, kind: input, shape index: {}]   ;;  %s2473_s11 = inlined_call_operand.vmem [shape: f32[1,16,1], index: 11, kind: input, shape index: {}]   ;;  %s2474_s12 = inlined_call_operand.vmem [shape: f32[16,16], index: 12, kind: input, shape index: {}]   ;;  %s2475_s13 = inlined_call_operand.vmem [shape: f32[5,16], index: 13, kind: input, shape index: {}]   ;;  %s2476_s14 = inlined_call_operand.vmem [shape: f32[1,16], index: 14, kind: input, shape index: {}]   ;;  %s2477_s15 = inlined_call_operand.vmem [shape: f32[16,16], index: 15, kind: input, shape index: {}]   ;;  %s2478_s16 = inlined_call_operand.vmem [shape: f32[1,16], index: 16, kind: input, shape index: {}]   ;;  %s2479_s17 = inlined_call_operand.vmem [shape: f32[16,6], index: 17, kind: input, shape index: {}]   ;;  %s2480_s18 = inlined_call_operand.vmem [shape: f32[1,6], index: 18, kind: input, shape index: {}]   ;;  %s2481_s19 = inlined_call_operand.hbm [shape: f32[2,6], index: 19, kind: output, shape index: {}]  }
   0x1   :  { %2484 = sst [smem:[#allocation5_spill]] %s2462_s0 }
   0x2   :  { %2485 = sst [smem:[#allocation6_spill]] %s2463_s1 }
   0x3   :  { %2486 = sst [smem:[#allocation7_spill]] %s2464_s2 }
   0x4   :  { %2487 = sst [smem:[#allocation8_spill]] %s2465_s3 }
   0x5   :  { %s2488_s20 = sld [smem:[#allocation5_spill]]  ;;  %vm75_vm0 = vcmask 1045504   ;;  %v2030_v3 = vmov 0.0   ;;  %vm2031_vm1 = vmmov 0   ;;  %vm71_vm2 = vcmask 97280  }
   0x6   :  { %1612 = vmatprep.subr.bf16.mxu0 %v2030_v3  ;;  %1618 = vmatprep.subr.bf16.mxu1 %v2030_v3  ;;  %s2489_s26 = sld [smem:[#allocation8_spill]] }
   0x7   :  { %1614 = vmatprep.mubr.msk.bf16.mxu0 %vm2031_vm1, %v2030_v3  ;;  %1620 = vmatprep.mubr.msk.bf16.mxu1 %vm2031_vm1, %v2030_v3 }
   0xb   :  { %v65_v0 = vld [vmem:[%s2488_s20] sm:$0xff]  ;;  %v66_v1 = vld [vmem:[%s2488_s20 + $0x8] sm:$0xf]  ;;  %v67_v2 = vld [vmem:[%s2488_s20 + $0x10] sm:$0xff] }
   0xc   :  { %v69_v4 = vpack.c.bf16 %v66_v1, %v65_v0  ;;  %v68_v5 = vld [vmem:[%s2488_s20 + $0x18] sm:$0xf]  ;;  %v64_v7 = vld [vmem:[%s2489_s26] sm:$0x3] }
   0xd   :  { %v70_v6 = vpack.c.bf16 %v68_v5, %v67_v2 }
   0xe   :  { %v77_v8 = vsel %vm75_vm0, %v69_v4, 0 }
   0xf   :  { %1613 = vmatpush3.bf16.msra.mxu0 %v77_v8  ;;  %v120_v9 = vsel %vm75_vm0, %v70_v6, 0 }
  0x10   :  { %1619 = vmatpush3.bf16.msra.mxu1 %v120_v9 }
  0x11   :  { %24 = vsyncpa [#allocation3], 0  ;;  %s2490_s29 = sld [smem:[#allocation6_spill]]  ;;  %vm172_vm3 = vcmask 1043456   ;;  %s2032_s20 = smov 3   ;;  %vm183_vm4 = vcmask 23552  }
  0x12   :  { %1615 = vmatmul.mubr.msk.bf16.vlgmr.msra.gmra.mxu0 %vm71_vm2, %v64_v7  ;;  %vm186_vm5 = vcmask 154624   ;;  %s2033_s21 = smov 126   ;;  %s2034_s1 = smov 124   ;;  %v2001_v35 = vld [vmem:[%s2466_s4] sm:$0xff]   ;;  %vm250_vm6 = vcmask 326656   ;;  %v226_v36 = vld [vmem:[%s2467_s5 + $0x10] sm:$0xff] }
  0x13   :  { %1621 = vmatmul.mubr.msk.bf16.vlgmr.msra.gmra.mxu1 %vm71_vm2, %v64_v7  ;;  %s2035_s23 = smov 125   ;;  %s2036_s24 = smov 127   ;;  %1630 = vmatprep.mubr.msk.bf16.mxu0 %vm250_vm6, %v2001_v35  ;;  %v224_v37 = vld [vmem:[%s2467_s5] sm:$0xff]  ;;  %v2037_v38 = vmov 0   ;;  %v225_v39 = vld [vmem:[%s2467_s5 + $0x8] sm:$0xff]  ;;  %vm2038_vm7 = vmmov 1  }
  0x14   :  { %1640 = vmatprep.mubr.msk.bf16.mxu1 %vm250_vm6, %v2001_v35  ;;  %1819 = vset.pattern.permute.xlu1 %v2037_v38  ;;  %vm1478_vm8 = vmpackc.low %vm2038_vm7, %vm186_vm5  ;;  %v2002_v60 = vld [vmem:[%s2466_s4 + $0x8] ss:$0 sps:$4 sm:$0xff]   ;;  %vm395_vm9 = vcmask 171008   ;;  %vm525_vm10 = vcmask 982016   ;;  %vm670_vm13 = vcmask 187392   ;;  %vm985_vm0 = vcmask 588800  }
  0x15   :  { %1820 = vset.pattern.permute.xlu0 %v2037_v38  ;;  %vm1490_vm11 = vmpackc.low %vm2038_vm7, %vm395_vm9  ;;  %vm1081_vm2 = vcmask 162816  }
  0x16   :  { %vm1493_vm12 = vmpackc.low %vm395_vm9, %vm395_vm9 }
  0x17   :  { %v164_v10 = vld [vmem:[%s2490_s29] sm:$0xf]  ;;  %v165_v11 = vld [vmem:[%s2490_s29 + $0x4] sm:$0xf]  ;;  %vm1508_vm14 = vmpackc.low %vm2038_vm7, %vm670_vm13  ;;  %vm1209_vm7 = vcmask 130048  }
  0x18   :  { %v168_v12 = vrot.slane %v164_v10, 4  ;;  %v169_v14 = vrot.slane %v165_v11, 4  ;;  %vm1511_vm15 = vmpackc.low %vm670_vm13, %vm670_vm13 }
  0xd2   :  { %v113_v13 = vpop.f32.mrf.mxu0 }
  0xd3   :  { %v162_v15 = vmax.f32 %v113_v13, 0.0  ;;  %v156_v16 = vpop.f32.mrf.mxu1 }
  0xd4   :  { %v163_v17 = vmax.f32 %v156_v16, 0.0  ;;  %v1616_v18 = vpop.f32.mrf.mxu0 }
  0xd5   :  { %v1622_v19 = vpop.f32.mrf.mxu1  ;;  %v173_v20 = vsel %vm172_vm3, %v162_v15, %v168_v12 }
  0xd6   :  { %v116_v21 = vpop.f32.mrf.mxu0  ;;  %v174_v22 = vsel %vm172_vm3, %v163_v17, %v169_v14 }
  0xd7   :  { %v159_v23 = vpop.f32.mrf.mxu1  ;;  %v1794_v24 = vpack.i.bf16 %v174_v22, %v173_v20 }
  0xd8   :  { %v1617_v25 = vpop.f32.mrf.mxu0 }
  0xd9   :  { %v1623_v26 = vpop.f32.mrf.mxu1  ;;  %1795 = vrot.lane.b32.xlu0 %v1794_v24, %s2032_s20 }
 0x14b   :  { %v1796_v27 = vpop.permute.xlu0 %1795 }
 0x14c   :  { %v1798_v28 = vunpack.i.h.bf16 %v1796_v27  ;;  %v1797_v29 = vunpack.i.l.bf16 %v1796_v27 }
 0x14e   :  { %v185_v30 = vsel %vm183_vm4, 0.0, %v1798_v28  ;;  %v184_v31 = vsel %vm183_vm4, 0.0, %v1797_v29 }
 0x14f   :  { %v188_v32 = vsel %vm186_vm5, %v185_v30, 0.0  ;;  %v187_v33 = vsel %vm186_vm5, %v184_v31, 0.0  ;;  %vm1196_vm5 = vcmask 130112  }
 0x150   :  { %v1804_v34 = vpack.i.bf16 %v188_v32, %v187_v33 }
 0x152   :  { %1805 = vrot.lane.b32.xlu1 %v1804_v34, %s2033_s21  ;;  %1800 = vrot.lane.b32.xlu0 %v1804_v34, %s2034_s1 }
 0x156   :  { %1810 = vrot.lane.b32.xlu1 %v1804_v34, %s2035_s23  ;;  %1815 = vrot.lane.b32.xlu0 %v1804_v34, %s2036_s24 }
 0x15a   :  { %239 = vperm.xlu1 %1819, %v226_v36   ;;  %229 = vperm.xlu0 %1820, %v224_v37  }
 0x15e   :  { %234 = vperm.xlu1 %1819, %v225_v39  }
 0x1c4   :  { %v1806_v40 = vpop.permute.xlu1 %1805  ;;  %v1801_v41 = vpop.permute.xlu0 %1800 }
 0x1c5   :  { %v1803_v42 = vunpack.i.h.bf16 %v1801_v41  ;;  %v1802_v43 = vunpack.i.l.bf16 %v1801_v41  ;;  %v1808_v48 = vunpack.i.h.bf16 %v1806_v40  ;;  %v1807_v49 = vunpack.i.l.bf16 %v1806_v40 }
 0x1c7   :  { %v223_v44 = vpack.c.bf16 %v1803_v42, %v1803_v42  ;;  %v220_v45 = vpack.c.bf16 %v1802_v43, %v1802_v43 }
 0x1c8   :  { %v1811_v46 = vpop.permute.xlu1 %1810  ;;  %v1816_v47 = vpop.permute.xlu0 %1815 }
 0x1c9   :  { %v1813_v50 = vunpack.i.h.bf16 %v1811_v46  ;;  %v1812_v51 = vunpack.i.l.bf16 %v1811_v46  ;;  %1778 = vmatprep.subr.msk.bf16.mxu0 %vm172_vm3, %v220_v45  ;;  %1779 = vmatprep.subr.msk.bf16.mxu1 %vm172_vm3, %v223_v44  ;;  %v1817_v52 = vunpack.i.l.bf16 %v1816_v47  ;;  %v258_v53 = vsel %vm172_vm3, %v220_v45, 0 }
 0x1ca   :  { %v309_v54 = vsel %vm172_vm3, %v223_v44, 0  ;;  %v1818_v57 = vunpack.i.h.bf16 %v1816_v47  ;;  %1625 = vmatpush3.bf16.msra.mxu0 %v258_v53  ;;  %v2003_v53 = vld [vmem:[%s2468_s6] sm:$0xff]  }
 0x1cb   :  { %v219_v55 = vpack.c.bf16 %v1812_v51, %v1807_v49  ;;  %v222_v56 = vpack.c.bf16 %v1813_v50, %v1808_v48  ;;  %1635 = vmatpush3.bf16.msra.mxu1 %v309_v54  ;;  %v1479_v58 = vpack.c.bf16 %v1817_v52, %v184_v31  ;;  %v501_v54 = vld [vmem:[%s2469_s7 + $0x10] sm:$0xff] }
 0x1cc   :  { %v1484_v59 = vpack.c.bf16 %v1818_v57, %v185_v30 }
 0x1cd   :  { %1626 = vmatprep.subr.bf16.mxu0 %v219_v55  ;;  %1636 = vmatprep.subr.bf16.mxu1 %v222_v56 }
 0x1ce   :  { %1627 = vmatpush3.bf16.msra.mxu0 %v219_v55  ;;  %v500_v55 = vld [vmem:[%s2469_s7 + $0x8] sm:$0xff] }
 0x1cf   :  { %1637 = vmatpush3.bf16.msra.mxu1 %v222_v56  ;;  %1628 = vmatprep.subr.msk.bf16.mxu0 %vm1478_vm8, %v1479_v58  ;;  %v499_v56 = vld [vmem:[%s2469_s7] sm:$0xff] }
 0x1d0   :  { %1638 = vmatprep.subr.msk.bf16.mxu1 %vm1478_vm8, %v1484_v59 }
 0x1d2   :  { %1629 = vmatpush3.bf16.msk.msra.mxu0 %vm1478_vm8, %v1479_v58 }
 0x1d3   :  { %1639 = vmatpush3.bf16.msk.msra.mxu1 %vm1478_vm8, %v1484_v59 }
 0x1d5   :  { %1631 = vmatmul.mubr.msk.bf16.vlgmr.msra.gmra.mxu0 %vm250_vm6, %v2002_v60  ;;  %v240_v61 = vpop.permute.xlu1 %239  ;;  %v230_v2 = vpop.permute.xlu0 %229 }
 0x1d6   :  { %1641 = vmatmul.mubr.msk.bf16.vlgmr.msra.gmra.mxu1 %vm250_vm6, %v2002_v60  ;;  %1660 = vmatprep.mubr.msk.bf16.mxu0 %vm525_vm10, %v2003_v53  ;;  %vm1207_vm6 = vcmask 1041409  }
 0x1d7   :  { %1680 = vmatprep.mubr.msk.bf16.mxu1 %vm525_vm10, %v2003_v53 }
 0x1d9   :  { %v235_v12 = vpop.permute.xlu1 %234 }
 0x295   :  { %v1632_v62 = vpop.f32.mrf.mxu0 }
 0x296   :  { %v303_v63 = vadd.f32 %v1632_v62, %v240_v61  ;;  %v1642_v0 = vpop.f32.mrf.mxu1 }
 0x297   :  { %v354_v1 = vadd.f32 %v1642_v0, %v240_v61  ;;  %v294_v4 = vpop.f32.mrf.mxu0 }
 0x298   :  { %v361_v5 = vmax.f32 %v303_v63, 0.0  ;;  %v345_v6 = vpop.f32.mrf.mxu1  ;;  %v295_v9 = vadd.f32 %v294_v4, %v230_v2 }
 0x299   :  { %v364_v7 = vmax.f32 %v354_v1, 0.0  ;;  %v1633_v8 = vpop.f32.mrf.mxu0  ;;  %v346_v13 = vadd.f32 %v345_v6, %v230_v2 }
 0x29a   :  { %v1643_v10 = vpop.f32.mrf.mxu1  ;;  %v359_v18 = vmax.f32 %v295_v9, 0.0 }
 0x29b   :  { %v1821_v11 = vpack.i.bf16 %v364_v7, %v361_v5  ;;  %v297_v14 = vpop.f32.mrf.mxu0  ;;  %v362_v20 = vmax.f32 %v346_v13, 0.0 }
 0x29c   :  { %v298_v15 = vadd.f32 %v297_v14, %v235_v12  ;;  %v348_v16 = vpop.f32.mrf.mxu1 }
 0x29d   :  { %v349_v17 = vadd.f32 %v348_v16, %v235_v12  ;;  %1822 = vrot.lane.b32.xlu1 %v1821_v11, %s2032_s20 }
 0x29e   :  { %v360_v19 = vmax.f32 %v298_v15, 0.0 }
 0x29f   :  { %v363_v21 = vmax.f32 %v349_v17, 0.0 }
 0x2a0   :  { %v1826_v22 = vpack.i.bf16 %v360_v19, %v359_v18 }
 0x2a1   :  { %v1831_v23 = vpack.i.bf16 %v363_v21, %v362_v20 }
 0x2a2   :  { %1827 = vrot.lane.b32.xlu0 %v1826_v22, %s2032_s20 }
 0x2a3   :  { %1832 = vrot.lane.b32.xlu1 %v1831_v23, %s2032_s20 }
 0x30f   :  { %v1823_v24 = vpop.permute.xlu1 %1822 }
 0x310   :  { %v1825_v25 = vunpack.i.h.bf16 %v1823_v24  ;;  %v1824_v26 = vunpack.i.l.bf16 %v1823_v24 }
 0x312   :  { %v2207_v27 = vsel %vm183_vm4, 0.0, %v1825_v25  ;;  %v2210_v28 = vsel %vm183_vm4, 0.0, %v1824_v26 }
 0x313   :  { %v401_v29 = vsel %vm395_vm9, %v2207_v27, 0.0  ;;  %v398_v30 = vsel %vm395_vm9, %v2210_v28, 0.0 }
 0x314   :  { %v1828_v31 = vpop.permute.xlu0 %1827  ;;  %v1836_v32 = vpack.i.bf16 %v401_v29, %v398_v30 }
 0x315   :  { %v1833_v33 = vpop.permute.xlu1 %1832  ;;  %v1830_v34 = vunpack.i.h.bf16 %v1828_v31  ;;  %v1829_v35 = vunpack.i.l.bf16 %v1828_v31 }
 0x316   :  { %v1835_v36 = vunpack.i.h.bf16 %v1833_v33  ;;  %v1834_v37 = vunpack.i.l.bf16 %v1833_v33  ;;  %1837 = vrot.lane.b32.xlu0 %v1836_v32, %s2034_s1 }
 0x317   :  { %v390_v38 = vsel %vm183_vm4, 0.0, %v1830_v34  ;;  %v389_v39 = vsel %vm183_vm4, 0.0, %v1829_v35 }
 0x318   :  { %v393_v40 = vsel %vm183_vm4, 0.0, %v1835_v36  ;;  %v392_v41 = vsel %vm183_vm4, 0.0, %v1834_v37  ;;  %v397_v42 = vsel %vm395_vm9, %v390_v38, 0.0  ;;  %v396_v43 = vsel %vm395_vm9, %v389_v39, 0.0 }
 0x319   :  { %v400_v44 = vsel %vm395_vm9, %v393_v40, 0.0  ;;  %v399_v45 = vsel %vm395_vm9, %v392_v41, 0.0  ;;  %v2225_v46 = vpack.c.bf16 %v393_v40, %v392_v41  ;;  %v2227_v47 = vpack.c.bf16 %v390_v38, %v389_v39 }
 0x31a   :  { %v1846_v48 = vpack.i.bf16 %v400_v44, %v399_v45  ;;  %v1841_v49 = vpack.i.bf16 %v397_v42, %v396_v43  ;;  %v1861_v50 = vpack.i.bf16 %v401_v29, %v400_v44  ;;  %v1851_v51 = vpack.i.bf16 %v398_v30, %v397_v42 }
 0x31b   :  { %v1866_v52 = vpack.i.bf16 %v399_v45, %v396_v43 }
 0x31c   :  { %1847 = vrot.lane.b32.xlu0 %v1846_v48, %s2034_s1  ;;  %1842 = vrot.lane.b32.xlu1 %v1841_v49, %s2034_s1 }
 0x320   :  { %1862 = vrot.lane.b32.xlu0 %v1861_v50, %s2035_s23  ;;  %1852 = vrot.lane.b32.xlu1 %v1851_v51, %s2035_s23 }
 0x324   :  { %1867 = vrot.lane.b32.xlu0 %v1866_v52, %s2035_s23  ;;  %1857 = vrot.lane.b32.xlu1 %v1836_v32, %s2033_s21 }
 0x328   :  { %1877 = vrot.lane.b32.xlu0 %v1846_v48, %s2033_s21  ;;  %1872 = vrot.lane.b32.xlu1 %v1841_v49, %s2033_s21 }
 0x32c   :  { %1887 = vrot.lane.b32.xlu0 %v1861_v50, %s2036_s24  ;;  %1882 = vrot.lane.b32.xlu1 %v1851_v51, %s2036_s24  ;;  %v2004_v50 = vld [vmem:[%s2468_s6 + $0x8] ss:$0 sps:$4 sm:$0xff]  }
 0x330   :  { %514 = vperm.xlu0 %1820, %v501_v54   ;;  %1892 = vrot.lane.b32.xlu1 %v1866_v52, %s2036_s24 }
 0x334   :  { %509 = vperm.xlu0 %1820, %v500_v55   ;;  %504 = vperm.xlu1 %1819, %v499_v56  }
 0x388   :  { %v1838_v57 = vpop.permute.xlu0 %1837 }
 0x389   :  { %v1840_v58 = vunpack.i.h.bf16 %v1838_v57  ;;  %v1839_v59 = vunpack.i.l.bf16 %v1838_v57 }
 0x38b   :  { %v498_v60 = vpack.c.bf16 %v1840_v58, %v1840_v58  ;;  %v490_v61 = vpack.c.bf16 %v1839_v59, %v1839_v59 }
 0x38d   :  { %1780 = vmatprep.subr.msk.bf16.mxu0 %vm172_vm3, %v490_v61  ;;  %1781 = vmatprep.subr.msk.bf16.mxu1 %vm172_vm3, %v498_v60  ;;  %v533_v62 = vsel %vm172_vm3, %v490_v61, 0  ;;  %v584_v63 = vsel %vm172_vm3, %v498_v60, 0 }
 0x38e   :  { %v1848_v0 = vpop.permute.xlu0 %1847  ;;  %1645 = vmatpush3.bf16.msra.mxu0 %v533_v62  ;;  %1665 = vmatpush3.bf16.msra.mxu1 %v584_v63  ;;  %v1843_v1 = vpop.permute.xlu1 %1842 }
 0x38f   :  { %v1850_v2 = vunpack.i.h.bf16 %v1848_v0  ;;  %v1849_v4 = vunpack.i.l.bf16 %v1848_v0  ;;  %v1845_v5 = vunpack.i.h.bf16 %v1843_v1  ;;  %v1844_v6 = vunpack.i.l.bf16 %v1843_v1 }
 0x391   :  { %v497_v7 = vpack.c.bf16 %v1850_v2, %v1849_v4  ;;  %v489_v8 = vpack.c.bf16 %v1845_v5, %v1844_v6 }
 0x392   :  { %v1863_v9 = vpop.permute.xlu0 %1862  ;;  %v1853_v10 = vpop.permute.xlu1 %1852 }
 0x393   :  { %v1865_v11 = vunpack.i.h.bf16 %v1863_v9  ;;  %v1864_v12 = vunpack.i.l.bf16 %v1863_v9  ;;  %v1855_v13 = vunpack.i.h.bf16 %v1853_v10  ;;  %v1854_v14 = vunpack.i.l.bf16 %v1853_v10  ;;  %1646 = vmatprep.subr.bf16.mxu0 %v489_v8  ;;  %1666 = vmatprep.subr.bf16.mxu1 %v497_v7 }
 0x394   :  { %1647 = vmatpush3.bf16.msra.mxu0 %v489_v8  ;;  %1667 = vmatpush3.bf16.msra.mxu1 %v497_v7 }
 0x395   :  { %v496_v15 = vpack.c.bf16 %v1865_v11, %v1864_v12  ;;  %v488_v16 = vpack.c.bf16 %v1855_v13, %v1854_v14 }
 0x396   :  { %v1868_v17 = vpop.permute.xlu0 %1867  ;;  %v1858_v18 = vpop.permute.xlu1 %1857 }
 0x397   :  { %v1870_v19 = vunpack.i.h.bf16 %v1868_v17  ;;  %v1869_v20 = vunpack.i.l.bf16 %v1868_v17  ;;  %v1860_v21 = vunpack.i.h.bf16 %v1858_v18  ;;  %v1859_v22 = vunpack.i.l.bf16 %v1858_v18  ;;  %1648 = vmatprep.subr.bf16.mxu0 %v488_v16  ;;  %1668 = vmatprep.subr.bf16.mxu1 %v496_v15 }
 0x398   :  { %1649 = vmatpush3.bf16.msra.mxu0 %v488_v16  ;;  %1669 = vmatpush3.bf16.msra.mxu1 %v496_v15 }
 0x399   :  { %v495_v23 = vpack.c.bf16 %v1870_v19, %v1860_v21  ;;  %v487_v24 = vpack.c.bf16 %v1869_v20, %v1859_v22 }
 0x39a   :  { %v1878_v25 = vpop.permute.xlu0 %1877  ;;  %v1873_v26 = vpop.permute.xlu1 %1872 }
 0x39b   :  { %v1880_v29 = vunpack.i.h.bf16 %v1878_v25  ;;  %v1879_v30 = vunpack.i.l.bf16 %v1878_v25  ;;  %v1875_v31 = vunpack.i.h.bf16 %v1873_v26  ;;  %v1874_v32 = vunpack.i.l.bf16 %v1873_v26  ;;  %1650 = vmatprep.subr.bf16.mxu0 %v487_v24  ;;  %1670 = vmatprep.subr.bf16.mxu1 %v495_v23 }
 0x39c   :  { %1651 = vmatpush3.bf16.msra.mxu0 %v487_v24  ;;  %1671 = vmatpush3.bf16.msra.mxu1 %v495_v23 }
 0x39d   :  { %v494_v33 = vpack.c.bf16 %v1880_v29, %v1879_v30  ;;  %v486_v34 = vpack.c.bf16 %v1875_v31, %v1874_v32 }
 0x39e   :  { %v1888_v35 = vpop.permute.xlu0 %1887  ;;  %v1883_v36 = vpop.permute.xlu1 %1882 }
 0x39f   :  { %v1890_v37 = vunpack.i.h.bf16 %v1888_v35  ;;  %v1889_v38 = vunpack.i.l.bf16 %v1888_v35  ;;  %v1885_v39 = vunpack.i.h.bf16 %v1883_v36  ;;  %v1884_v40 = vunpack.i.l.bf16 %v1883_v36  ;;  %1652 = vmatprep.subr.bf16.mxu0 %v486_v34  ;;  %1672 = vmatprep.subr.bf16.mxu1 %v494_v33 }
 0x3a0   :  { %1653 = vmatpush3.bf16.msra.mxu0 %v486_v34  ;;  %1673 = vmatpush3.bf16.msra.mxu1 %v494_v33 }
 0x3a1   :  { %v493_v41 = vpack.c.bf16 %v1890_v37, %v1889_v38  ;;  %v485_v42 = vpack.c.bf16 %v1885_v39, %v1884_v40 }
 0x3a2   :  { %v1893_v43 = vpop.permute.xlu1 %1892 }
 0x3a3   :  { %v1895_v44 = vunpack.i.h.bf16 %v1893_v43  ;;  %v1894_v45 = vunpack.i.l.bf16 %v1893_v43  ;;  %1654 = vmatprep.subr.bf16.mxu0 %v485_v42  ;;  %1674 = vmatprep.subr.bf16.mxu1 %v493_v41  ;;  %v775_v43 = vld [vmem:[%s2471_s9 + $0x8] sm:$0xff] }
 0x3a4   :  { %1655 = vmatpush3.bf16.msra.mxu0 %v485_v42  ;;  %1675 = vmatpush3.bf16.msra.mxu1 %v493_v41  ;;  %v776_v41 = vld [vmem:[%s2471_s9 + $0x10] sm:$0xff]  ;;  %v2005_v42 = vld [vmem:[%s2470_s8] sm:$0xff]  }
 0x3a5   :  { %v1499_v48 = vpack.c.bf16 %v1895_v44, %v2207_v27  ;;  %v1491_v49 = vpack.c.bf16 %v1894_v45, %v2210_v28  ;;  %v774_v44 = vld [vmem:[%s2471_s9] sm:$0xff] }
 0x3a7   :  { %1656 = vmatprep.subr.msk.bf16.mxu0 %vm1490_vm11, %v1491_v49  ;;  %1676 = vmatprep.subr.msk.bf16.mxu1 %vm1490_vm11, %v1499_v48 }
 0x3a8   :  { %1657 = vmatpush3.bf16.msk.msra.mxu0 %vm1490_vm11, %v1491_v49  ;;  %1677 = vmatpush3.bf16.msk.msra.mxu1 %vm1490_vm11, %v1499_v48 }
 0x3a9   :  { %1658 = vmatprep.subr.msk.bf16.mxu0 %vm1493_vm12, %v2227_v47  ;;  %1678 = vmatprep.subr.msk.bf16.mxu1 %vm1493_vm12, %v2225_v46 }
 0x3ab   :  { %v515_v27 = vpop.permute.xlu0 %514 }
 0x3ac   :  { %1659 = vmatpush3.bf16.msk.msra.mxu0 %vm1493_vm12, %v2227_v47  ;;  %1679 = vmatpush3.bf16.msk.msra.mxu1 %vm1493_vm12, %v2225_v46 }
 0x3af   :  { %1661 = vmatmul.mubr.msk.bf16.vlgmr.msra.gmra.mxu0 %vm525_vm10, %v2004_v50  ;;  %1681 = vmatmul.mubr.msk.bf16.vlgmr.msra.gmra.mxu1 %vm525_vm10, %v2004_v50  ;;  %v505_v56 = vpop.permute.xlu1 %504  ;;  %v510_v61 = vpop.permute.xlu0 %509 }
 0x3b0   :  { %1700 = vmatprep.mubr.msk.bf16.mxu0 %vm525_vm10, %v2005_v42  ;;  %1720 = vmatprep.mubr.msk.bf16.mxu1 %vm525_vm10, %v2005_v42 }
 0x46f   :  { %v1662_v28 = vpop.f32.mrf.mxu0  ;;  %v1682_v51 = vpop.f32.mrf.mxu1 }
 0x470   :  { %v578_v52 = vadd.f32 %v1662_v28, %v515_v27  ;;  %v629_v53 = vadd.f32 %v1682_v51, %v515_v27 }
 0x471   :  { %v569_v54 = vpop.f32.mrf.mxu0  ;;  %v620_v55 = vpop.f32.mrf.mxu1 }
 0x472   :  { %v636_v57 = vmax.f32 %v578_v52, 0.0  ;;  %v639_v58 = vmax.f32 %v629_v53, 0.0  ;;  %v570_v62 = vadd.f32 %v569_v54, %v505_v56  ;;  %v621_v46 = vadd.f32 %v620_v55, %v505_v56 }
 0x473   :  { %v1663_v59 = vpop.f32.mrf.mxu0  ;;  %v1683_v60 = vpop.f32.mrf.mxu1 }
 0x474   :  { %v1896_v47 = vpack.i.bf16 %v639_v58, %v636_v57  ;;  %v634_v4 = vmax.f32 %v570_v62, 0.0  ;;  %v637_v5 = vmax.f32 %v621_v46, 0.0 }
 0x475   :  { %v572_v63 = vpop.f32.mrf.mxu0  ;;  %v623_v0 = vpop.f32.mrf.mxu1 }
 0x476   :  { %v573_v1 = vadd.f32 %v572_v63, %v510_v61  ;;  %v624_v2 = vadd.f32 %v623_v0, %v510_v61  ;;  %1897 = vrot.lane.b32.xlu1 %v1896_v47, %s2032_s20 }
 0x478   :  { %v635_v6 = vmax.f32 %v573_v1, 0.0  ;;  %v638_v7 = vmax.f32 %v624_v2, 0.0 }
 0x47a   :  { %v1901_v8 = vpack.i.bf16 %v635_v6, %v634_v4  ;;  %v1906_v9 = vpack.i.bf16 %v638_v7, %v637_v5 }
 0x47c   :  { %1907 = vrot.lane.b32.xlu1 %v1906_v9, %s2032_s20  ;;  %1902 = vrot.lane.b32.xlu0 %v1901_v8, %s2032_s20  ;;  %s2491_s20 = sld [smem:[#allocation7_spill]] }
 0x4e8   :  { %v1898_v10 = vpop.permute.xlu1 %1897 }
 0x4e9   :  { %v1900_v11 = vunpack.i.h.bf16 %v1898_v10  ;;  %v1899_v12 = vunpack.i.l.bf16 %v1898_v10 }
 0x4eb   :  { %v2277_v13 = vsel %vm183_vm4, 0.0, %v1900_v11  ;;  %v2280_v14 = vsel %vm183_vm4, 0.0, %v1899_v12 }
 0x4ec   :  { %v676_v15 = vsel %vm670_vm13, %v2277_v13, 0.0  ;;  %v673_v16 = vsel %vm670_vm13, %v2280_v14, 0.0 }
 0x4ed   :  { %v1911_v17 = vpack.i.bf16 %v676_v15, %v673_v16 }
 0x4ee   :  { %v1908_v18 = vpop.permute.xlu1 %1907  ;;  %v1903_v19 = vpop.permute.xlu0 %1902 }
 0x4ef   :  { %v1910_v20 = vunpack.i.h.bf16 %v1908_v18  ;;  %v1909_v21 = vunpack.i.l.bf16 %v1908_v18  ;;  %v1905_v22 = vunpack.i.h.bf16 %v1903_v19  ;;  %v1904_v23 = vunpack.i.l.bf16 %v1903_v19  ;;  %1912 = vrot.lane.b32.xlu0 %v1911_v17, %s2034_s1 }
 0x4f1   :  { %v668_v24 = vsel %vm183_vm4, 0.0, %v1910_v20  ;;  %v667_v25 = vsel %vm183_vm4, 0.0, %v1909_v21  ;;  %v665_v26 = vsel %vm183_vm4, 0.0, %v1905_v22  ;;  %v664_v29 = vsel %vm183_vm4, 0.0, %v1904_v23 }
 0x4f2   :  { %v675_v30 = vsel %vm670_vm13, %v668_v24, 0.0  ;;  %v674_v31 = vsel %vm670_vm13, %v667_v25, 0.0  ;;  %v2293_v32 = vpack.c.bf16 %v668_v24, %v667_v25  ;;  %v672_v33 = vsel %vm670_vm13, %v665_v26, 0.0 }
 0x4f3   :  { %v671_v34 = vsel %vm670_vm13, %v664_v29, 0.0  ;;  %v2297_v35 = vpack.c.bf16 %v665_v26, %v664_v29  ;;  %v1921_v36 = vpack.i.bf16 %v675_v30, %v674_v31  ;;  %v1936_v38 = vpack.i.bf16 %v676_v15, %v675_v30 }
 0x4f4   :  { %v1916_v37 = vpack.i.bf16 %v672_v33, %v671_v34  ;;  %v1926_v39 = vpack.i.bf16 %v673_v16, %v672_v33  ;;  %v1941_v40 = vpack.i.bf16 %v674_v31, %v671_v34  ;;  %vm1103_vm4 = vcmask 39936  }
 0x4f5   :  { %1922 = vrot.lane.b32.xlu0 %v1921_v36, %s2034_s1 }
 0x4f6   :  { %1917 = vrot.lane.b32.xlu1 %v1916_v37, %s2034_s1 }
 0x4f9   :  { %1937 = vrot.lane.b32.xlu0 %v1936_v38, %s2035_s23 }
 0x4fa   :  { %1927 = vrot.lane.b32.xlu1 %v1926_v39, %s2035_s23 }
 0x4fd   :  { %1942 = vrot.lane.b32.xlu0 %v1941_v40, %s2035_s23 }
 0x4fe   :  { %1932 = vrot.lane.b32.xlu1 %v1911_v17, %s2033_s21 }
 0x501   :  { %1952 = vrot.lane.b32.xlu0 %v1921_v36, %s2033_s21 }
 0x502   :  { %1947 = vrot.lane.b32.xlu1 %v1916_v37, %s2033_s21 }
 0x505   :  { %1962 = vrot.lane.b32.xlu0 %v1936_v38, %s2036_s24  ;;  %v2006_v38 = vld [vmem:[%s2470_s8 + $0x8] ss:$0 sps:$4 sm:$0xff]  }
 0x506   :  { %1957 = vrot.lane.b32.xlu1 %v1926_v39, %s2036_s24 }
 0x509   :  { %789 = vperm.xlu0 %1820, %v776_v41  }
 0x50a   :  { %1967 = vrot.lane.b32.xlu1 %v1941_v40, %s2036_s24 }
 0x50d   :  { %784 = vperm.xlu0 %1820, %v775_v43  }
 0x50e   :  { %779 = vperm.xlu1 %1819, %v774_v44  }
 0x561   :  { %v1913_v45 = vpop.permute.xlu0 %1912 }
 0x562   :  { %v1915_v48 = vunpack.i.h.bf16 %v1913_v45  ;;  %v1914_v49 = vunpack.i.l.bf16 %v1913_v45 }
 0x564   :  { %v773_v50 = vpack.c.bf16 %v1915_v48, %v1915_v48  ;;  %v765_v27 = vpack.c.bf16 %v1914_v49, %v1914_v49 }
 0x566   :  { %1782 = vmatprep.subr.msk.bf16.mxu0 %vm172_vm3, %v765_v27  ;;  %1783 = vmatprep.subr.msk.bf16.mxu1 %vm172_vm3, %v773_v50  ;;  %v807_v28 = vsel %vm172_vm3, %v765_v27, 0  ;;  %v858_v51 = vsel %vm172_vm3, %v773_v50, 0 }
 0x567   :  { %v1923_v52 = vpop.permute.xlu0 %1922  ;;  %1685 = vmatpush3.bf16.msra.mxu0 %v807_v28  ;;  %1705 = vmatpush3.bf16.msra.mxu1 %v858_v51 }
 0x568   :  { %v1925_v53 = vunpack.i.h.bf16 %v1923_v52  ;;  %v1924_v54 = vunpack.i.l.bf16 %v1923_v52  ;;  %v1918_v55 = vpop.permute.xlu1 %1917 }
 0x569   :  { %v1920_v56 = vunpack.i.h.bf16 %v1918_v55  ;;  %v1919_v57 = vunpack.i.l.bf16 %v1918_v55 }
 0x56a   :  { %v772_v58 = vpack.c.bf16 %v1925_v53, %v1924_v54 }
 0x56b   :  { %v764_v59 = vpack.c.bf16 %v1920_v56, %v1919_v57  ;;  %v1938_v60 = vpop.permute.xlu0 %1937 }
 0x56c   :  { %v1940_v61 = vunpack.i.h.bf16 %v1938_v60  ;;  %v1939_v47 = vunpack.i.l.bf16 %v1938_v60  ;;  %v1928_v62 = vpop.permute.xlu1 %1927  ;;  %1706 = vmatprep.subr.bf16.mxu1 %v772_v58 }
 0x56d   :  { %v1930_v46 = vunpack.i.h.bf16 %v1928_v62  ;;  %v1929_v63 = vunpack.i.l.bf16 %v1928_v62  ;;  %1686 = vmatprep.subr.bf16.mxu0 %v764_v59  ;;  %1707 = vmatpush3.bf16.msra.mxu1 %v772_v58 }
 0x56e   :  { %v771_v0 = vpack.c.bf16 %v1940_v61, %v1939_v47  ;;  %1687 = vmatpush3.bf16.msra.mxu0 %v764_v59 }
 0x56f   :  { %v763_v1 = vpack.c.bf16 %v1930_v46, %v1929_v63  ;;  %v1943_v2 = vpop.permute.xlu0 %1942  ;;  %v968_v63 = vld [vmem:[%s2473_s11] sm:$0xff] }
 0x570   :  { %v1945_v4 = vunpack.i.h.bf16 %v1943_v2  ;;  %v1944_v5 = vunpack.i.l.bf16 %v1943_v2  ;;  %v1933_v6 = vpop.permute.xlu1 %1932  ;;  %1708 = vmatprep.subr.bf16.mxu1 %v771_v0 }
 0x571   :  { %v1935_v7 = vunpack.i.h.bf16 %v1933_v6  ;;  %v1934_v8 = vunpack.i.l.bf16 %v1933_v6  ;;  %1688 = vmatprep.subr.bf16.mxu0 %v763_v1  ;;  %1709 = vmatpush3.bf16.msra.mxu1 %v771_v0 }
 0x572   :  { %1689 = vmatpush3.bf16.msra.mxu0 %v763_v1  ;;  %v969_v1 = vld [vmem:[%s2473_s11 + $0x8] sm:$0xff] }
 0x573   :  { %v770_v9 = vpack.c.bf16 %v1945_v4, %v1935_v7  ;;  %v762_v10 = vpack.c.bf16 %v1944_v5, %v1934_v8  ;;  %v1953_v11 = vpop.permute.xlu0 %1952 }
 0x574   :  { %v1955_v12 = vunpack.i.h.bf16 %v1953_v11  ;;  %v1954_v15 = vunpack.i.l.bf16 %v1953_v11  ;;  %v1948_v16 = vpop.permute.xlu1 %1947 }
 0x575   :  { %v1950_v17 = vunpack.i.h.bf16 %v1948_v16  ;;  %v1949_v18 = vunpack.i.l.bf16 %v1948_v16  ;;  %1690 = vmatprep.subr.bf16.mxu0 %v762_v10  ;;  %1710 = vmatprep.subr.bf16.mxu1 %v770_v9 }
 0x576   :  { %v769_v19 = vpack.c.bf16 %v1955_v12, %v1954_v15  ;;  %1691 = vmatpush3.bf16.msra.mxu0 %v762_v10  ;;  %1711 = vmatpush3.bf16.msra.mxu1 %v770_v9 }
 0x577   :  { %v761_v20 = vpack.c.bf16 %v1950_v17, %v1949_v18  ;;  %v1963_v21 = vpop.permute.xlu0 %1962 }
 0x578   :  { %v1965_v22 = vunpack.i.h.bf16 %v1963_v21  ;;  %v1964_v23 = vunpack.i.l.bf16 %v1963_v21  ;;  %v1958_v24 = vpop.permute.xlu1 %1957  ;;  %1712 = vmatprep.subr.bf16.mxu1 %v769_v19 }
 0x579   :  { %v1960_v25 = vunpack.i.h.bf16 %v1958_v24  ;;  %v1959_v26 = vunpack.i.l.bf16 %v1958_v24  ;;  %1692 = vmatprep.subr.bf16.mxu0 %v761_v20 }
 0x57a   :  { %v768_v29 = vpack.c.bf16 %v1965_v22, %v1964_v23  ;;  %1693 = vmatpush3.bf16.msra.mxu0 %v761_v20  ;;  %1713 = vmatpush3.bf16.msra.mxu1 %v769_v19 }
 0x57b   :  { %v760_v30 = vpack.c.bf16 %v1960_v25, %v1959_v26 }
 0x57c   :  { %v1968_v31 = vpop.permute.xlu1 %1967  ;;  %1714 = vmatprep.subr.bf16.mxu1 %v768_v29 }
 0x57d   :  { %v1970_v33 = vunpack.i.h.bf16 %v1968_v31  ;;  %v1969_v34 = vunpack.i.l.bf16 %v1968_v31  ;;  %1694 = vmatprep.subr.bf16.mxu0 %v760_v30 }
 0x57e   :  { %1695 = vmatpush3.bf16.msra.mxu0 %v760_v30  ;;  %1715 = vmatpush3.bf16.msra.mxu1 %v768_v29 }
 0x57f   :  { %v1517_v36 = vpack.c.bf16 %v1970_v33, %v2277_v13  ;;  %v1509_v37 = vpack.c.bf16 %v1969_v34, %v2280_v14 }
 0x581   :  { %1696 = vmatprep.subr.msk.bf16.mxu0 %vm1508_vm14, %v1509_v37  ;;  %1716 = vmatprep.subr.msk.bf16.mxu1 %vm1508_vm14, %v1517_v36 }
 0x582   :  { %1697 = vmatpush3.bf16.msk.msra.mxu0 %vm1508_vm14, %v1509_v37  ;;  %1717 = vmatpush3.bf16.msk.msra.mxu1 %vm1508_vm14, %v1517_v36  ;;  %v2007_v37 = vld [vmem:[%s2472_s10] sm:$0xff]  }
 0x583   :  { %1698 = vmatprep.subr.msk.bf16.mxu0 %vm1511_vm15, %v2297_v35  ;;  %1718 = vmatprep.subr.msk.bf16.mxu1 %vm1511_vm15, %v2293_v32 }
 0x584   :  { %v790_v13 = vpop.permute.xlu0 %789 }
 0x586   :  { %1699 = vmatpush3.bf16.msk.msra.mxu0 %vm1511_vm15, %v2297_v35  ;;  %1719 = vmatpush3.bf16.msk.msra.mxu1 %vm1511_vm15, %v2293_v32 }
 0x587   :  { %1724 = vmatprep.subr.bf16.mxu0 %v2030_v3  ;;  %1738 = vmatprep.subr.bf16.mxu1 %v2030_v3 }
 0x588   :  { %v785_v49 = vpop.permute.xlu0 %784 }
 0x589   :  { %1701 = vmatmul.mubr.msk.bf16.vlgmr.msra.gmra.mxu0 %vm525_vm10, %v2006_v38  ;;  %1721 = vmatmul.mubr.msk.bf16.vlgmr.msra.gmra.mxu1 %vm525_vm10, %v2006_v38  ;;  %v780_v42 = vpop.permute.xlu1 %779 }
 0x58a   :  { %1734 = vmatprep.mubr.msk.bf16.mxu0 %vm2031_vm1, %v2030_v3  ;;  %1748 = vmatprep.mubr.msk.bf16.mxu1 %vm2031_vm1, %v2030_v3 }
 0x649   :  { %v1702_v14 = vpop.f32.mrf.mxu0  ;;  %v1722_v39 = vpop.f32.mrf.mxu1 }
 0x64a   :  { %v852_v35 = vadd.f32 %v1702_v14, %v790_v13  ;;  %v903_v40 = vadd.f32 %v1722_v39, %v790_v13 }
 0x64b   :  { %v843_v32 = vpop.f32.mrf.mxu0  ;;  %v894_v41 = vpop.f32.mrf.mxu1 }
 0x64c   :  { %v2349_v43 = vmax.f32 %v852_v35, 0.0  ;;  %v2351_v44 = vmax.f32 %v903_v40, 0.0  ;;  %v844_v50 = vadd.f32 %v843_v32, %v780_v42  ;;  %v895_v27 = vadd.f32 %v894_v41, %v780_v42 }
 0x64d   :  { %v1703_v45 = vpop.f32.mrf.mxu0  ;;  %v1723_v48 = vpop.f32.mrf.mxu1 }
 0x64e   :  { %v1971_v28 = vpack.i.bf16 %v2351_v44, %v2349_v43  ;;  %v2356_v55 = vmax.f32 %v844_v50, 0.0  ;;  %v2358_v56 = vmax.f32 %v895_v27, 0.0 }
 0x64f   :  { %v846_v51 = vpop.f32.mrf.mxu0  ;;  %v897_v52 = vpop.f32.mrf.mxu1 }
 0x650   :  { %v847_v53 = vadd.f32 %v846_v51, %v785_v49  ;;  %v898_v54 = vadd.f32 %v897_v52, %v785_v49  ;;  %1972 = vrot.lane.b32.xlu1 %v1971_v28, %s2033_s21  ;;  %v1996_v0 = vpack.i.bf16 %v2358_v56, %v2356_v55 }
 0x652   :  { %v2360_v57 = vmax.f32 %v847_v53, 0.0  ;;  %v2362_v58 = vmax.f32 %v898_v54, 0.0 }
 0x654   :  { %v958_v59 = vpack.c.bf16 %v2360_v57, %v2356_v55  ;;  %v963_v60 = vpack.c.bf16 %v2362_v58, %v2358_v56  ;;  %v1981_v61 = vpack.i.bf16 %v2362_v58, %v2358_v56  ;;  %v1976_v47 = vpack.i.bf16 %v2360_v57, %v2356_v55  ;;  %v1102_v56 = vld [vmem:[%s2475_s13] sm:$0x1f] }
 0x655   :  { %v1991_v62 = vpack.i.bf16 %v2351_v44, %v2362_v58  ;;  %v1986_v46 = vpack.i.bf16 %v2349_v43, %v2360_v57  ;;  %v1100_v57 = vld [vmem:[%s2474_s12 + $0x8] sm:$0xff]  ;;  %v1099_v58 = vld [vmem:[%s2474_s12] sm:$0xff] }
 0x656   :  { %1982 = vrot.lane.b32.xlu1 %v1981_v61, %s2033_s21  ;;  %1977 = vrot.lane.b32.xlu0 %v1976_v47, %s2033_s21  ;;  %s2039_s21 = smov [#allocation2]  }
 0x65a   :  { %1992 = vrot.lane.b32.xlu1 %v1991_v62, %s2036_s24  ;;  %1987 = vrot.lane.b32.xlu0 %v1986_v46, %s2036_s24 }
 0x65e   :  { %972 = vperm.xlu1 %1819, %v968_v63   ;;  %1997 = vrot.lane.b32.xlu0 %v1996_v0, %s2036_s24 }
 0x662   :  { %977 = vperm.xlu0 %1820, %v969_v1  }
 0x6c2   :  { %v1973_v2 = vpop.permute.xlu1 %1972 }
 0x6c3   :  { %v1975_v4 = vunpack.i.h.bf16 %v1973_v2  ;;  %v1974_v5 = vunpack.i.l.bf16 %v1973_v2 }
 0x6c5   :  { %v967_v6 = vpack.c.bf16 %v1975_v4, %v1975_v4  ;;  %v962_v7 = vpack.c.bf16 %v1974_v5, %v1974_v5 }
 0x6c7   :  { %v990_v8 = vsel %vm172_vm3, %v962_v7, 0  ;;  %v1034_v9 = vsel %vm172_vm3, %v967_v6, 0  ;;  %vm1107_vm3 = vcmask 1044480  }
 0x6c8   :  { %v1983_v10 = vpop.permute.xlu1 %1982  ;;  %1725 = vmatpush3.bf16.msra.mxu0 %v990_v8  ;;  %1739 = vmatpush3.bf16.msra.mxu1 %v1034_v9  ;;  %v1978_v11 = vpop.permute.xlu0 %1977 }
 0x6c9   :  { %v1985_v12 = vunpack.i.h.bf16 %v1983_v10  ;;  %v1984_v15 = vunpack.i.l.bf16 %v1983_v10  ;;  %v1980_v16 = vunpack.i.h.bf16 %v1978_v11  ;;  %v1979_v17 = vunpack.i.l.bf16 %v1978_v11  ;;  %1726 = vmatprep.subr.bf16.mxu0 %v2030_v3  ;;  %1740 = vmatprep.subr.bf16.mxu1 %v2030_v3 }
 0x6cb   :  { %v966_v18 = vpack.c.bf16 %v1985_v12, %v1984_v15  ;;  %v961_v19 = vpack.c.bf16 %v1980_v16, %v1979_v17 }
 0x6cc   :  { %v1993_v20 = vpop.permute.xlu1 %1992  ;;  %v1988_v21 = vpop.permute.xlu0 %1987 }
 0x6cd   :  { %v1995_v22 = vunpack.i.h.bf16 %v1993_v20  ;;  %v1994_v23 = vunpack.i.l.bf16 %v1993_v20  ;;  %v1990_v24 = vunpack.i.h.bf16 %v1988_v21  ;;  %v1989_v25 = vunpack.i.l.bf16 %v1988_v21  ;;  %1727 = vmatpush3.bf16.msra.mxu0 %v961_v19  ;;  %1741 = vmatpush3.bf16.msra.mxu1 %v966_v18  ;;  %v1293_v20 = vld [vmem:[%s2477_s15 + $0x8] sm:$0xff]  ;;  %v1292_v21 = vld [vmem:[%s2477_s15] sm:$0xff] }
 0x6ce   :  { %1742 = vmatprep.subr.bf16.mxu1 %v2030_v3  ;;  %1728 = vmatprep.subr.bf16.mxu0 %v2030_v3 }
 0x6cf   :  { %v965_v26 = vpack.c.bf16 %v1995_v22, %v1994_v23  ;;  %v960_v29 = vpack.c.bf16 %v1990_v24, %v1989_v25  ;;  %v1530_v23 = vld [vmem:[%s2476_s14] ss:$0 sm:$0xff] }
 0x6d0   :  { %v1998_v30 = vpop.permute.xlu0 %1997 }
 0x6d1   :  { %v2000_v31 = vunpack.i.h.bf16 %v1998_v30  ;;  %v1999_v33 = vunpack.i.l.bf16 %v1998_v30  ;;  %1729 = vmatpush3.bf16.msra.mxu0 %v960_v29  ;;  %1743 = vmatpush3.bf16.msra.mxu1 %v965_v26 }
 0x6d2   :  { %1730 = vmatprep.subr.bf16.mxu0 %v2030_v3  ;;  %1744 = vmatprep.subr.bf16.mxu1 %v2030_v3 }
 0x6d3   :  { %v964_v34 = vpack.c.bf16 %v2000_v31, %v2351_v44  ;;  %v959_v36 = vpack.c.bf16 %v1999_v33, %v2349_v43  ;;  %v1377_v31 = vld [vmem:[%s2479_s17 + $0x8] sm:$0xff]  ;;  %v1376_v33 = vld [vmem:[%s2479_s17] sm:$0xff]  ;;  %s1466_s17 = sshll.u32 %s2039_s21, 4  ;;  %s1467_s17 = int_to_ptr.vmem [resolvable:$true] %s1466_s17 }
 0x6d4   :  { %p2013_p1 = scmp.lt.s32.totalorder %s1467_s17, %s1467_s17 }
 0x6d5   :  { %1731 = vmatpush3.bf16.msra.mxu0 %v959_v36  ;;  %1745 = vmatpush3.bf16.msra.mxu1 %v964_v34  ;;  %v1531_v34 = vld [vmem:[%s2478_s16] ss:$0 sm:$0xff]  ;;  %s2008_s16 = scalar_lea.vmem %s1467_s17, 32 }
 0x6d6   :  { %1732 = vmatprep.subr.bf16.mxu0 %v2030_v3  ;;  %1746 = vmatprep.subr.bf16.mxu1 %v2030_v3  ;;  %p2009_p0 = scmp.ne.s32.totalorder %s1467_s17, %s2008_s16  ;;  %p2014_p2 = scmp.lt.s32.totalorder %s2008_s16, %s2008_s16 }
 0x6d8   :  { %p2015_p3 = por %p2014_p2, %p2013_p1 }
 0x6d9   :  { %1733 = vmatpush3.bf16.msra.mxu0 %v958_v59  ;;  %1747 = vmatpush3.bf16.msra.mxu1 %v963_v60  ;;  %v973_v38 = vpop.permute.xlu1 %972  ;;  %v1101_v59 = vld [vmem:[%s2491_s20] sm:$0x3]  ;;  %v1185_v60 = vlaneseq }
 0x6da   :  { %1752 = vmatprep.subr.mxu0 %v2030_v3  ;;  %1757 = vmatprep.subr.mxu1 %v2030_v3  ;;  %p2016_p4 = pnand %p2015_p3, %p2009_p0 }
 0x6db   :  { %v1186_v61 = vand.u32 127, %v1185_v60  ;;  %v1188_v46 = vshrl.u32 %v1185_v60, 7 }
 0x6dc   :  { %1735 = vmatmul.mubr.msk.bf16.vlgmr.msra.gmra.mxu0 %vm985_vm0, %v2007_v37  ;;  %1749 = vmatmul.mubr.msk.bf16.vlgmr.msra.gmra.mxu1 %vm985_vm0, %v2007_v37 }
 0x6dd   :  { %1754 = vmatprep.mubr.msk.f32.mxu0 %vm2031_vm1, %v2030_v3  ;;  %1761 = vmatprep.mubr.msk.f32.mxu1 %vm2031_vm1, %v2030_v3  ;;  %v978_v32 = vpop.permute.xlu0 %977  ;;  %v1191_v62 = vadd.s32 4294967288, %v1186_v61  ;;  %v1189_v4 = vsub.s32 %v1186_v61, %v1188_v46 }
 0x6de   :  { %1753 = vmatpush3.msk.msra.mxu0 %vm1107_vm3, %v1102_v56  ;;  %1758 = vmatpush3.msra.mxu1 %v1100_v57 }
 0x6df   :  { %1759 = vmatprep.subr.mxu1 %v2030_v3  ;;  %1764 = vmatprep.subr.mxu0 %v2030_v3  ;;  %v1194_v1 = vsub.s32 %v1191_v62, %v1188_v46 }
 0x6e0   :  { %1760 = vmatpush3.msra.mxu1 %v1099_v58 }
 0x6e1   :  { %1771 = vmatprep.subr.mxu1 %v2030_v3 }
 0x6e4   :  { %1755 = vmatmul.mubr.msk.f32.vlgmr.msra.gmra.mxu0 %vm1103_vm4, %v1101_v59 }
 0x6e5   :  { %1768 = vmatprep.mubr.msk.f32.mxu0 %vm2031_vm1, %v2030_v3  ;;  %1765 = vmatpush3.msra.mxu0 %v1293_v20 }
 0x6e6   :  { %1766 = vmatprep.subr.mxu0 %v2030_v3 }
 0x6e7   :  { %1767 = vmatpush3.msra.mxu0 %v1292_v21 }
 0x79c   :  { %v1026_v13 = vpop.f32.mrf.mxu0  ;;  %v1070_v14 = vpop.f32.mrf.mxu1 }
 0x79d   :  { %v1027_v39 = vadd.f32 %v1026_v13, %v973_v38  ;;  %v1071_v44 = vadd.f32 %v1070_v14, %v973_v38 }
 0x79e   :  { %v1736_v35 = vpop.f32.mrf.mxu0  ;;  %v1750_v40 = vpop.f32.mrf.mxu1 }
 0x79f   :  { %v1077_v41 = vmax.f32 %v1027_v39, 0.0  ;;  %v1079_v52 = vmax.f32 %v1071_v44, 0.0  ;;  %v1533_v39 = vld [vmem:[%s2480_s18] ss:$0 sm:$0xff] }
 0x7a0   :  { %v1029_v42 = vpop.f32.mrf.mxu0  ;;  %v1073_v43 = vpop.f32.mrf.mxu1 }
 0x7a1   :  { %v1030_v45 = vadd.f32 %v1029_v42, %v978_v32  ;;  %v1074_v48 = vadd.f32 %v1073_v43, %v978_v32  ;;  %v1082_v49 = vsel %vm1081_vm2, %v1077_v41, 0.0  ;;  %v1088_v55 = vsel %vm1081_vm2, %v1079_v52, 0.0 }
 0x7a2   :  { %v1751_v50 = vpop.f32.mrf.mxu1  ;;  %1083 = vadd.xlane.f32.xlu1 %v1082_v49  ;;  %v1737_v27 = vpop.f32.mrf.mxu0 }
 0x7a3   :  { %v1078_v28 = vmax.f32 %v1030_v45, 0.0  ;;  %v1080_v51 = vmax.f32 %v1074_v48, 0.0 }
 0x7a4   :  { %v1177_v18 = vpop.f32.mrf.mxu0 }
 0x7a5   :  { %v1091_v53 = vsel %vm1081_vm2, %v1080_v51, 0.0  ;;  %v1085_v54 = vsel %vm1081_vm2, %v1078_v28, 0.0 }
 0x7a6   :  { %1092 = vadd.xlane.f32.xlu1 %v1091_v53  ;;  %1086 = vadd.xlane.f32.xlu0 %v1085_v54  ;;  %v1756_v19 = vpop.f32.mrf.mxu0 }
 0x7aa   :  { %1089 = vadd.xlane.f32.xlu0 %v1088_v55 }
 0x82b   :  { %v1084_v47 = vpop.xlane.xlu1 %1083 }
 0x82c   :  { %v1095_v5 = vmul.f32 0.05, %v1084_v47 }
 0x82e   :  { %v1190_v10 = vrot.slane %v1095_v5, %v1189_v4 }
 0x82f   :  { %v1093_v63 = vpop.xlane.xlu1 %1092  ;;  %v1087_v0 = vpop.xlane.xlu0 %1086 }
 0x830   :  { %v1096_v2 = vmul.f32 0.05, %v1087_v0  ;;  %v1098_v6 = vmul.f32 0.05, %v1093_v63 }
 0x832   :  { %v1195_v8 = vrot.slane %v1096_v2, %v1194_v1  ;;  %v1205_v11 = vrot.slane %v1098_v6, %v1194_v1 }
 0x833   :  { %v1090_v7 = vpop.xlane.xlu0 %1089 }
 0x834   :  { %v1097_v9 = vmul.f32 0.05, %v1090_v7  ;;  %v1197_v15 = vsel %vm1196_vm5, %v1195_v8, %v1190_v10 }
 0x836   :  { %v1201_v12 = vrot.slane %v1097_v9, %v1189_v4 }
 0x838   :  { %v1206_v16 = vsel %vm1196_vm5, %v1205_v11, %v1201_v12 }
 0x839   :  { %v1208_v17 = vsel %vm1207_vm6, %v1206_v16, %v1197_v15 }
 0x83a   :  { %1762 = vmatmul.mubr.msk.f32.vlgmr.msra.gmra.mxu1 %vm1209_vm7, %v1208_v17 }
 0x83b   :  { %1775 = vmatprep.mubr.msk.f32.mxu1 %vm2031_vm1, %v2030_v3  ;;  %1772 = vmatpush3.msra.mxu1 %v1377_v31  ;;  %vm1458_vm1 = vcmask 41984  }
 0x83c   :  { %1773 = vmatprep.subr.mxu1 %v2030_v3 }
 0x83d   :  { %1774 = vmatpush3.msra.mxu1 %v1376_v33 }
 0x8fa   :  { %v1278_v22 = vpop.f32.mrf.mxu1 }
 0x8fb   :  { %v1279_v24 = vadd.f32 %v1278_v22, %v1177_v18 }
 0x8fc   :  { %v1763_v25 = vpop.f32.mrf.mxu1 }
 0x8fd   :  { %v1289_v26 = vadd.f32 %v1530_v23, %v1279_v24 }
 0x8ff   :  { %v1290_v29 = vmax.f32 %v1289_v26, 0.0 }
 0x901   :  { %v1291_v30 = vmul.f32 0.999995, %v1290_v29 }
 0x903   :  { %1769 = vmatmul.mubr.msk.f32.vlgmr.msra.gmra.mxu0 %vm1209_vm7, %v1291_v30 }
 0x9c3   :  { %v1370_v36 = vpop.f32.mrf.mxu0 }
 0x9c4   :  { %v1371_v37 = vadd.f32 %v1531_v34, %v1370_v36 }
 0x9c5   :  { %v1770_v38 = vpop.f32.mrf.mxu0 }
 0x9c6   :  { %v1374_v13 = vmax.f32 %v1371_v37, 0.0 }
 0x9c8   :  { %v1375_v14 = vmul.f32 0.999995, %v1374_v13 }
 0x9ca   :  { %1776 = vmatmul.mubr.msk.f32.vlgmr.msra.gmra.mxu1 %vm1209_vm7, %v1375_v14 }
 0xa8a   :  { %v1454_v35 = vpop.f32.mrf.mxu1 }
 0xa8b   :  { %v1455_v3 = vadd.f32 %v1533_v39, %v1454_v35 }
 0xa8c   :  { %v1777_v40 = vpop.f32.mrf.mxu1 }
 0xa8d   :  { %1459 = vst.msk [vmem:[#allocation2] sm:$0x3] %vm1458_vm1, %v1455_v3 }
 0xa8e   :  { %2019 = shalt.err (!%p2016_p4)
}
 0xa8f   :  { %1469 = dma.vmem_to_hbm [thread:$0]  %s1467_s17, 32, %s2481_s19, [#allocation3]  }
 0xa90   :  { %2028 = dma.done.wait [#allocation3], 32  }
 0xa91   :  { %2029 = vsyncadd [#allocation3], 4294967264 }
 0xa92   :  { %1473 = vsyncpa [#allocation3], 1 }

</bundles_post_ra>
